<compile_context>
chip_gen: v7x
topology: tpu7x:2x2x1
jax: 0.10.0
libtpu: 0.0.40
codegen_flags: <defaults>
</compile_context>

<pallas_src>
import functools
import math

import jax
import jax.numpy as jnp
from jax.experimental import pallas as pl
from jax.experimental.pallas import tpu as pltpu

EPS = 1e-6                      # reagent.preprocessing.normalization.EPS
ALMOST_ONE = 1.0 - EPS          # self.almost_one


def _cdiv(a, b):
    return -(-a // b)


def _round_up(a, b):
    return _cdiv(a, b) * b


@functools.lru_cache(maxsize=None)
def _tpu_budget():
    """Returns (num_tensorcores, target in+out bytes per grid step, vmem_limit_bytes)."""
    vmem_phys = 0
    cores = 1
    try:
        info = pltpu.get_tpu_info()
        vmem_phys = int(getattr(info, "vmem_capacity_bytes", 0) or 0)
        for attr in ("num_tensorcores", "tensorcore_count", "num_cores"):
            v = getattr(info, attr, None)
            if v:
                cores = int(v)
                break
        else:
            # v7x: 64 MiB VMEM per TC, 2 TCs/chip; v5e/v6e: 128 MiB, 1 TC.
            cores = 2 if (0 < vmem_phys <= (64 << 20)) else 1
    except Exception:
        pass
    if vmem_phys > (64 << 20):
        # v5e / v6e (128 MiB physical VMEM): 8 MiB input tiles, generous scoped limit.
        return cores, 16 << 20, 64 << 20
    # v7x (64 MiB physical / 32 MiB scoped default) or unknown: stay conservative.
    return cores, 8 << 20, 28 << 20


def _pick_tiles(rows, row_bytes, cores, target_step_bytes):
    """Pick (grid_n, block_rows). block_rows is a multiple of 8 unless it equals rows."""
    if rows <= 8:
        return 1, rows                                   # full-dim block: always legal
    target_rows = max(8, (target_step_bytes // max(row_bytes, 1)) // 8 * 8)
    if target_rows >= rows and cores == 1:
        return 1, rows                                   # single-core: one big tile
    grid_n = _cdiv(rows, target_rows)
    if cores > 1:
        grid_n = _round_up(grid_n, cores)                # balance v7x's 2 TensorCores
    block_rows = _round_up(_cdiv(rows, grid_n), 8)
    if block_rows >= rows:
        return 1, rows
    grid_n = _cdiv(rows, block_rows)
    if cores > 1 and grid_n > 1 and grid_n % cores:
        block_rows2 = _round_up(_cdiv(rows, _round_up(grid_n, cores)), 8)
        if 0 < block_rows2 < rows:
            block_rows = block_rows2
            grid_n = _cdiv(rows, block_rows)
    return grid_n, block_rows


def _postprocess_kernel(x_ref, scale_ref, min_ref, o_ref):
    # Exact reference association: (almost_one + clamp(x, -a, a)) * scale + min
    x = x_ref[...].astype(jnp.float32)                   # in-kernel cast (mem-bound kernel)
    clamped = jnp.clip(x, -ALMOST_ONE, ALMOST_ONE)
    # scale_ref / min_ref are (1, L): broadcast over the batch (sublane) rows.
    o_ref[...] = (ALMOST_ONE + clamped) * scale_ref[...] + min_ref[...]


@functools.partial(jax.jit, static_argnames=("min_pallas_bytes",))
def postprocess_continuous(x, scaling_factor, min_serving_value, *, min_pallas_bytes=1 << 20):
    """x: (B, F); scaling_factor / min_serving_value: (F,). Returns f32 (B, F)."""
    B, F = x.shape
    scale = scaling_factor.reshape(1, F).astype(jnp.float32)
    minv = min_serving_value.reshape(1, F).astype(jnp.float32)

    in_bytes = B * F * x.dtype.itemsize
    if B == 0 or F == 0 or in_bytes < min_pallas_bytes:
        # Tiny input: one fused XLA elementwise op beats pallas_call launch overhead.
        xf = x.astype(jnp.float32)
        return (ALMOST_ONE + jnp.clip(xf, -ALMOST_ONE, ALMOST_ONE)) * scale + minv

    cores, target_step_bytes, vmem_limit = _tpu_budget()

    # Lane-dense layout: fold k consecutive batch rows into lanes so the last dim is a
    # multiple of 128 (unmasked vst). Fold only when it requires zero padding:
    # B divisible by k, >= one full 8-sublane tile of folded rows, sane folded width.
    k = 1
    if F % 128 != 0:
        cand = 128 // math.gcd(F, 128)
        if cand > 1 and F * cand <= 16384 and B % cand == 0 and B >= 8 * cand:
            k = cand
    rows = B // k
    lane_width = k * F

    x_f = x.reshape(rows, lane_width) if k > 1 else x     # row-major reshape: no data movement
    scale_f = jnp.tile(scale, (1, k)) if k > 1 else scale  # one-time O(k*F) layout plumbing
    min_f = jnp.tile(minv, (1, k)) if k > 1 else minv

    row_bytes = lane_width * (x.dtype.itemsize + 4)        # input bytes + f32 output bytes
    grid_n, block_rows = _pick_tiles(rows, row_bytes, cores, target_step_bytes)

    out = pl.pallas_call(
        _postprocess_kernel,
        out_shape=jax.ShapeDtypeStruct((rows, lane_width), jnp.float32),
        grid_spec=pltpu.PrefetchScalarGridSpec(
            num_scalar_prefetch=0,
            grid=(grid_n,),
            in_specs=[
                pl.BlockSpec((block_rows, lane_width), lambda i: (i, 0)),  # streaming input
                pl.BlockSpec((1, lane_width), lambda i: (0, 0)),           # scale (resident)
                pl.BlockSpec((1, lane_width), lambda i: (0, 0)),           # min   (resident)
            ],
            out_specs=pl.BlockSpec((block_rows, lane_width), lambda i: (i, 0)),
        ),
        compiler_params=pltpu.CompilerParams(
            dimension_semantics=("parallel",),
            vmem_limit_bytes=vmem_limit,
        ),
        cost_estimate=pl.CostEstimate(
            flops=5 * B * F,
            transcendentals=0,
            bytes_accessed=B * F * (x.dtype.itemsize + 4) + 2 * F * 4,
        ),
    )(x_f, scale_f, min_f)

    return out.reshape(B, F) if k > 1 else out


def postprocess_passthrough(x):
    # DISCRETE_ACTION / DO_NOT_PREPROCESS branch: identity (no kernel needed).
    return x


if __name__ == "__main__":
    key = jax.random.PRNGKey(0)
    num_features = 32   # num_output_features of the action normalization

    # Deterministic synthetic NormalizationParameters (CONTINUOUS_ACTION):
    # per-feature min_value / max_value, sorted by feature id.
    kx, kmin, krange = jax.random.split(key, 3)
    min_value = jax.random.uniform(kmin, (num_features,), minval=-5.0, maxval=0.0)
    value_range = jax.random.uniform(krange, (num_features,), minval=1.0, maxval=10.0)
    max_value = min_value + value_range

    min_serving_value = min_value.astype(jnp.float32)
    scaling_factor = ((max_value - min_value) / (2.0 * (1.0 - EPS))).astype(jnp.float32)

    def reference(x):
        return (ALMOST_ONE + jnp.clip(x, -ALMOST_ONE, ALMOST_ONE)) * scaling_factor + min_serving_value

    ok = True

    # 1) Small batch forced through the Pallas kernel (k=1, single full-dim block).
    x_small = jax.random.normal(kx, (8, num_features), dtype=jnp.float32)
    out_small = jax.block_until_ready(
        postprocess_continuous(x_small, scaling_factor, min_serving_value, min_pallas_bytes=0)
    )
    ok &= out_small.shape == x_small.shape and out_small.dtype == jnp.float32
    ok &= bool(jnp.allclose(out_small, reference(x_small), atol=1e-5, rtol=1e-5))

    # 2) Larger batch forced through the kernel to exercise lane-folding (k=4 -> 128 lanes).
    x_big = jax.random.normal(kx, (256, num_features), dtype=jnp.float32)
    out_big = jax.block_until_ready(
        postprocess_continuous(x_big, scaling_factor, min_serving_value, min_pallas_bytes=0)
    )
    ok &= out_big.shape == x_big.shape
    ok &= bool(jnp.allclose(out_big, reference(x_big), atol=1e-5, rtol=1e-5))

    # 3) Default dispatch for tiny input (fused pure-jnp fast path).
    out_fast = jax.block_until_ready(
        postprocess_continuous(x_small, scaling_factor, min_serving_value)
    )
    ok &= bool(jnp.allclose(out_fast, reference(x_small), atol=1e-6, rtol=1e-6))

    # 4) Identity branch (DISCRETE_ACTION / DO_NOT_PREPROCESS).
    ok &= bool(jnp.array_equal(postprocess_passthrough(x_small), x_small))

    assert ok, "mismatch vs reference"
    print("KERNEL_OK")
</pallas_src>

<mosaic_0001>
module attributes {stable_mosaic.version = 11 : i64} {
  func.func @_postprocess_kernel(%arg0: i32, %arg1: memref<8x32xf32, #tpu.memory_space<vmem>>, %arg2: memref<1x32xf32, #tpu.memory_space<vmem>>, %arg3: memref<1x32xf32, #tpu.memory_space<vmem>>, %arg4: memref<8x32xf32, #tpu.memory_space<vmem>>) attributes {dimension_semantics = [#tpu.dimension_semantics<parallel>], iteration_bounds = array<i64: 1>, scalar_prefetch = 0 : i64, scratch_operands = 0 : i64, tpu.core_type = #tpu.core_type<tc>, window_params = [{transform_indices = @transform_0, window_bounds = array<i64: 8, 32>}, {pipeline_mode = #tpu.pipeline_mode<synchronous>, transform_indices = @transform_1, window_bounds = array<i64: 1, 32>}, {pipeline_mode = #tpu.pipeline_mode<synchronous>, transform_indices = @transform_2, window_bounds = array<i64: 1, 32>}, {transform_indices = @transform_3, window_bounds = array<i64: 8, 32>}]} {
    %c0 = arith.constant 0 : index
    %c0_0 = arith.constant 0 : index
    %0 = vector.load %arg1[%c0, %c0_0] : memref<8x32xf32, #tpu.memory_space<vmem>>, vector<8x32xf32>
    %cst = arith.constant -0.999998986 : f32
    %cst_1 = arith.constant 0.999998986 : f32
    %1 = vector.broadcast %cst : f32 to vector<8x32xf32>
    %2 = arith.maximumf %1, %0 : vector<8x32xf32>
    %3 = vector.broadcast %cst_1 : f32 to vector<8x32xf32>
    %4 = arith.minimumf %3, %2 : vector<8x32xf32>
    %cst_2 = arith.constant 0.999998986 : f32
    %5 = vector.broadcast %cst_2 : f32 to vector<8x32xf32>
    %6 = arith.addf %5, %4 : vector<8x32xf32>
    %c0_3 = arith.constant 0 : index
    %c0_4 = arith.constant 0 : index
    %7 = vector.load %arg2[%c0_3, %c0_4] : memref<1x32xf32, #tpu.memory_space<vmem>>, vector<1x32xf32>
    %8 = vector.broadcast %7 : vector<1x32xf32> to vector<8x32xf32>
    %9 = arith.mulf %6, %8 : vector<8x32xf32>
    %c0_5 = arith.constant 0 : index
    %c0_6 = arith.constant 0 : index
    %10 = vector.load %arg3[%c0_5, %c0_6] : memref<1x32xf32, #tpu.memory_space<vmem>>, vector<1x32xf32>
    %11 = vector.broadcast %10 : vector<1x32xf32> to vector<8x32xf32>
    %12 = arith.addf %9, %11 : vector<8x32xf32>
    %c0_7 = arith.constant 0 : index
    %c0_8 = arith.constant 0 : index
    %13 = vector.load %arg4[%c0_7, %c0_8] : memref<8x32xf32, #tpu.memory_space<vmem>>, vector<8x32xf32>
    tpu.vector_store %arg4[%c0_7, %c0_8], %12 {strides = array<i32>} : memref<8x32xf32, #tpu.memory_space<vmem>>, vector<8x32xf32>,
    return
  }
  func.func @transform_0(%arg0: i32) -> (i32, i32) {
    %c0_i32 = arith.constant 0 : i32
    %c0_i32_0 = arith.constant 0 : i32
    return %arg0, %c0_i32 : i32, i32
  }
  func.func @transform_1(%arg0: i32) -> (i32, i32) {
    %c0_i32 = arith.constant 0 : i32
    %c0_i32_0 = arith.constant 0 : i32
    %c0_i32_1 = arith.constant 0 : i32
    return %c0_i32, %c0_i32_0 : i32, i32
  }
  func.func @transform_2(%arg0: i32) -> (i32, i32) {
    %c0_i32 = arith.constant 0 : i32
    %c0_i32_0 = arith.constant 0 : i32
    %c0_i32_1 = arith.constant 0 : i32
    return %c0_i32, %c0_i32_0 : i32, i32
  }
  func.func @transform_3(%arg0: i32) -> (i32, i32) {
    %c0_i32 = arith.constant 0 : i32
    %c0_i32_0 = arith.constant 0 : i32
    return %arg0, %c0_i32 : i32, i32
  }
}

</mosaic_0001>

<bundles_post_ra>
// kernel: postprocess_continuous.1
= control target key start
LH: loop header
LB: loop body
LE: loop exit
PB: predicated region body
PF: predicated region fallthrough
CT: control target
= control target key end

     0   :  { %8 = vsyncpa [#allocation3], 0  ;;  %s169_s0 = inlined_call_operand.hbm [shape: f32[8,32], index: 0, kind: input, shape index: {}]   ;;  %s170_s1 = inlined_call_operand.vmem [shape: f32[1,32], index: 1, kind: input, shape index: {}]   ;;  %s171_s2 = inlined_call_operand.vmem [shape: f32[1,32], index: 2, kind: input, shape index: {}]   ;;  %s172_s3 = inlined_call_operand.hbm [shape: f32[8,32], index: 3, kind: output, shape index: {}]  }
   0x1   :  { %9 = vsyncpa [#allocation4], 0  ;;  %s117_s12 = smov [#allocation2]   ;;  %s69_s16 = scalar_lea.hbm %s169_s0, 128 }
   0x2   :  { %s16_s13 = sshll.u32 %s117_s12, 4  ;;  %p70_p0 = scmp.ne.s32.totalorder %s169_s0, %s69_s16  ;;  %s17_s13 = int_to_ptr.vmem [resolvable:$true] %s16_s13 }
   0x3   :  { %p73_p1 = scmp.lt.u32.totalorder %s69_s16, %s169_s0 }
   0x5   :  { %p75_p2 = pnand %p73_p1, %p70_p0 }
   0x7   :  { %78 = shalt.err (!%p75_p2)
}
   0x8   :  { %s79_s21 = scalar_lea.vmem %s17_s13, 128  ;;  %p84_p4 = scmp.lt.s32.totalorder %s17_s13, %s17_s13 }
   0x9   :  { %p80_p3 = scmp.ne.s32.totalorder %s17_s13, %s79_s21  ;;  %p85_p5 = scmp.lt.s32.totalorder %s79_s21, %s79_s21 }
   0xb   :  { %p86_p6 = por %p85_p5, %p84_p4 }
   0xd   :  { %p87_p7 = pnand %p86_p6, %p80_p3 }
   0xf   :  { %90 = shalt.err (!%p87_p7)
}
  0x10   :  { %19 = dma.hbm_to_vmem [thread:$0]  %s169_s0, 128, %s17_s13, [#allocation3]  }
  0x11   :  { %113 = dma.done.wait [#allocation3], 128  }
  0x12   :  { %114 = vsyncadd [#allocation3], 4294967168  ;;  %v27_v0 = vld [vmem:[#allocation2] sm:$0xff]  ;;  %s118_s28 = smov [#allocation5]   ;;  %vm47_vm0 = vcmask 261120  }
  0x13   :  { %v64_v1 = vclamps-f32 %v27_v0, 0.999999  ;;  %v65_v2 = vld [vmem:[%s170_s1] ss:$0 sm:$0xff]  ;;  %s55_s29 = sshll.u32 %s118_s28, 4  ;;  %s56_s29 = int_to_ptr.vmem [resolvable:$true] %s55_s29 }
  0x14   :  { %v66_v4 = vld [vmem:[%s171_s2] ss:$0 sm:$0xff]  ;;  %s91_s0 = scalar_lea.vmem %s56_s29, 128  ;;  %p96_p9 = scmp.lt.s32.totalorder %s56_s29, %s56_s29 }
  0x15   :  { %v30_v3 = vadd.f32 0.999999, %v64_v1  ;;  %p92_p8 = scmp.ne.s32.totalorder %s56_s29, %s91_s0  ;;  %p97_p10 = scmp.lt.s32.totalorder %s91_s0, %s91_s0 }
  0x17   :  { %v38_v5 = vmul.f32 %v65_v2, %v30_v3  ;;  %p98_p11 = por %p97_p10, %p96_p9 }
  0x19   :  { %v46_v6 = vadd.f32 %v66_v4, %v38_v5  ;;  %p99_p12 = pnand %p98_p11, %p92_p8 }
  0x1b   :  { %48 = vst.msk [vmem:[#allocation5] sm:$0xff] %vm47_vm0, %v46_v6 }
  0x1c   :  { %102 = shalt.err (!%p99_p12)
}
  0x1d   :  { %s103_s4 = scalar_lea.hbm %s172_s3, 128 }
  0x1e   :  { %p104_p13 = scmp.ne.s32.totalorder %s172_s3, %s103_s4  ;;  %p107_p0 = scmp.lt.u32.totalorder %s103_s4, %s172_s3 }
  0x20   :  { %p109_p1 = pnand %p107_p0, %p104_p13 }
  0x22   :  { %112 = shalt.err (!%p109_p1)
}
  0x23   :  { %58 = dma.vmem_to_hbm [thread:$0]  %s56_s29, 128, %s172_s3, [#allocation4]  }
  0x24   :  { %115 = dma.done.wait [#allocation4], 128  }
  0x25   :  { %116 = vsyncadd [#allocation4], 4294967168 }
  0x26   :  { %62 = vsyncpa [#allocation3], 1 }
  0x27   :  { %63 = vsyncpa [#allocation4], 1 }

</bundles_post_ra>
